<compile_context>
chip_gen: v7x
topology: tpu7x:2x2x1
jax: 0.10.0
libtpu: 0.0.40
codegen_flags: <defaults>
</compile_context>

<pallas_src>
import jax
import jax.numpy as jnp
from jax import lax
from jax.experimental import pallas as pl
from jax.experimental.pallas import tpu as pltpu


def _round_up(x: int, m: int) -> int:
    return (x + m - 1) // m * m


def _default_exp_dtype():
    """bf16 exp only where the EUP has a bf16 path (v6e / v7x); f32 elsewhere (v5e...)."""
    try:
        kind = jax.devices()[0].device_kind.lower()
        if "v6" in kind or "v7" in kind:
            return jnp.bfloat16
    except Exception:
        pass
    return jnp.float32


def _make_kernel(inv_p: float, exp_dtype, matmul_dtype):
    def kernel(a_t_ref, m_ref, act_ref, out_ref, acc_ref):
        # a_t_ref: (K_pad, P_TILE) f32  pixel quadratic-form features (transposed, lane-dense)
        # m_ref:   (K_pad, S_TILE) f32  per-sample quadratic-form coefficients
        # act_ref: (B, P_TILE)          activation tile (bf16)
        # out_ref: (1, B, S_TILE) f32   per-split partial output (resident across P axis)
        # acc_ref: (B, S_TILE) f32      VMEM accumulator scratch
        p_step = pl.program_id(2)

        @pl.when(p_step == 0)
        def _init():
            acc_ref[...] = jnp.zeros_like(acc_ref)

        # q[p, s] = sum_d w_d * (c_d[p] - mu_d[s])^2   (w_d < 0 folded in).
        # Tiny-K contraction on the MXU; kept f32 (the three terms cancel).
        q = lax.dot_general(
            a_t_ref[...], m_ref[...],
            dimension_numbers=(((0,), (0,)), ((), ())),
            preferred_element_type=jnp.float32,
        )                                                  # (P_TILE, S_TILE) f32

        pdf = jnp.exp(q.astype(exp_dtype))                 # EUP exp; bf16 on v6e/v7x

        acc_ref[...] += jnp.dot(
            act_ref[...].astype(matmul_dtype),
            pdf.astype(matmul_dtype),
            preferred_element_type=jnp.float32,
        )

        @pl.when(p_step == pl.num_programs(2) - 1)
        def _finalize():
            out_ref[0] = acc_ref[...] * inv_p              # mean over TRUE pixel count

    return kernel


class AnisotropicGaussianSampler:
    """JAX/Pallas port of the PyTorch AnisotropicGaussianSampler (forward only)."""

    def __init__(self, input_shape, output_shape, *,
                 p_tile=2048, s_tile=512, p_splits=None,
                 exp_dtype=None, matmul_dtype=jnp.bfloat16):
        self.input_shape = tuple(int(d) for d in input_shape)
        self.output_shape = tuple(int(d) for d in output_shape)
        self.ndims = len(self.input_shape)
        self.exp_dtype = _default_exp_dtype() if exp_dtype is None else exp_dtype
        self.matmul_dtype = matmul_dtype

        # ---- static problem sizes -------------------------------------------
        P = 1
        for d in self.input_shape:
            P *= d
        S = 1
        for d in self.output_shape:
            S *= d
        self.num_pixels = P
        self.num_samples = S

        K = 2 * self.ndims + 1
        self.K = K
        self.K_pad = _round_up(K, 8)                        # sublane multiple

        # Sample tiling (lane-dense output stores; >=256 fills the v6e/v7x MXU).
        self.s_tile = min(int(s_tile), _round_up(S, 128))
        self.S_pad = _round_up(S, self.s_tile)
        self.n_s_tiles = self.S_pad // self.s_tile

        # Pixel tiling (the reduction axis).
        self.p_tile = min(int(p_tile), _round_up(P, 128))
        n_p_tiles = -(-P // self.p_tile)

        # Megacore: if there is only one S tile, split the P reduction into
        # independent partial sums so a 2-TC chip (v7x) keeps both cores busy.
        if p_splits is None:
            p_splits = 2 if (self.n_s_tiles < 2 and n_p_tiles >= 2) else 1
        self.p_splits = int(p_splits)
        n_p_tiles = _round_up(n_p_tiles, self.p_splits)
        self.tiles_per_split = n_p_tiles // self.p_splits
        self.P_pad = n_p_tiles * self.p_tile

        # ---- cached pixel-side operands (fixed at construction) --------------
        grids = jnp.meshgrid(
            *[jnp.arange(d, dtype=jnp.float32) for d in self.input_shape],
            indexing="ij",
        )
        coord = jnp.stack(grids, axis=-1) / jnp.asarray(self.input_shape, jnp.float32)
        self.coords_flat = coord.reshape(-1, self.ndims)            # (P, ndims)

        feats = jnp.concatenate(
            [self.coords_flat * self.coords_flat,                   # c_d^2
             self.coords_flat,                                      # c_d
             jnp.ones((P, 1), jnp.float32)], axis=1)                # 1
        # Transposed + padded: (K_pad, P_pad), pixel axis lane-dense. Padded
        # columns are all-zero -> q = 0 there -> pdf = 1, killed by act = 0.
        self.a_t = jnp.pad(feats.T, ((0, self.K_pad - K), (0, self.P_pad - P)))

    def __call__(self, activations, sample_parameters):
        mu, sigma = sample_parameters
        mu = mu.reshape(-1, self.ndims).astype(jnp.float32)          # (S, ndims)
        sigma = sigma.reshape(-1, self.ndims).astype(jnp.float32)    # (S, ndims)

        B = activations.shape[0]
        P, S = self.num_pixels, self.num_samples
        K, K_pad = self.K, self.K_pad
        p_tile, s_tile = self.p_tile, self.s_tile
        P_pad, S_pad = self.P_pad, self.S_pad
        tiles_per_split = self.tiles_per_split

        # Quadratic-form coefficients per sample (q = A @ M).
        w = -0.5 / (sigma * sigma)                                   # (S, ndims), negative
        m = jnp.concatenate(
            [w.T,                                                    # * c_d^2
             (-2.0 * w * mu).T,                                      # * c_d
             jnp.sum(w * mu * mu, axis=-1, keepdims=True).T],        # * 1
            axis=0)                                                  # (K, S)
        m = jnp.pad(m, ((0, K_pad - K), (0, S_pad - S)))             # padded cols -> pdf=1, sliced off

        # Activations: flatten, cast once to the matmul dtype, zero-pad P.
        act = activations.reshape(B, P).astype(self.matmul_dtype)
        act = jnp.pad(act, ((0, 0), (0, P_pad - P)))

        kernel = _make_kernel(1.0 / float(P), self.exp_dtype, self.matmul_dtype)

        grid = (self.p_splits, self.n_s_tiles, tiles_per_split)      # reduction (P) last

        grid_spec = pltpu.PrefetchScalarGridSpec(
            num_scalar_prefetch=0,
            grid=grid,
            in_specs=[
                pl.BlockSpec((K_pad, p_tile),
                             lambda c, s, p: (0, c * tiles_per_split + p)),
                pl.BlockSpec((K_pad, s_tile), lambda c, s, p: (0, s)),
                pl.BlockSpec((B, p_tile),
                             lambda c, s, p: (0, c * tiles_per_split + p)),
            ],
            out_specs=pl.BlockSpec((1, B, s_tile), lambda c, s, p: (c, 0, s)),
            scratch_shapes=[pltpu.VMEM((B, s_tile), jnp.float32)],
        )

        # VMEM budget: ~4 full (p_tile x s_tile) temporaries (q f32 + bf16 copies)
        # plus double-buffered input tiles; clamp to a range safe on v5e/v6e/v7x.
        tile_bytes = p_tile * s_tile * 4
        est = 4 * tile_bytes + 4 * (K_pad + B) * (p_tile + s_tile) * 4 + (1 << 20)
        vmem_limit = int(max(32 << 20, min(est, 56 << 20)))

        out = pl.pallas_call(
            kernel,
            out_shape=jax.ShapeDtypeStruct((self.p_splits, B, S_pad), jnp.float32),
            grid_spec=grid_spec,
            compiler_params=pltpu.CompilerParams(
                dimension_semantics=("parallel", "parallel", "arbitrary"),
                vmem_limit_bytes=vmem_limit,
            ),
        )(self.a_t, m, act)

        corr = jnp.sum(out, axis=0)[:, :S]     # combine P splits, drop S padding
        return corr.reshape(B, *self.output_shape)


def _reference(coords_flat, mu, sigma, act_flat, output_shape):
    # Pure-JAX f32 reference matching the PyTorch semantics exactly.
    diff = coords_flat[:, None, :] - mu[None, :, :]                  # (P, S, ndims)
    q = (diff * diff) / (2.0 * sigma[None, :, :] ** 2)
    pdf = jnp.exp(-jnp.sum(q, axis=-1))                              # (P, S)
    corr = act_flat @ pdf / coords_flat.shape[0]                     # mean over pixels
    return corr.reshape(act_flat.shape[0], *output_shape)


def _run_case(key, batch, input_shape, output_shape, **sampler_kwargs):
    k_act, k_mu, k_sigma = jax.random.split(key, 3)
    ndims = len(input_shape)
    n_samples = 1
    for d in output_shape:
        n_samples *= d

    activations = jax.random.normal(k_act, (batch,) + tuple(input_shape),
                                    dtype=jnp.float32)
    mu = jax.random.uniform(k_mu, (n_samples, ndims), dtype=jnp.float32)
    sigma = jax.random.uniform(k_sigma, (n_samples, ndims), dtype=jnp.float32,
                               minval=0.1, maxval=0.5)

    sampler = AnisotropicGaussianSampler(input_shape, output_shape, **sampler_kwargs)
    out = jax.block_until_ready(sampler(activations, (mu, sigma)))

    ref = _reference(sampler.coords_flat, mu, sigma,
                     activations.reshape(batch, -1).astype(jnp.float32),
                     tuple(output_shape))

    assert out.shape == (batch,) + tuple(output_shape), out.shape
    # bf16 act/pdf MXU operands (and bf16 exp on v6e/v7x) -> slightly loose tolerance.
    assert jnp.allclose(out, ref, atol=1e-2, rtol=1e-2), (
        f"max abs err = {jnp.max(jnp.abs(out - ref))}"
    )
    return out


if __name__ == "__main__":
    key = jax.random.PRNGKey(0)
    k1, k2 = jax.random.split(key)

    # Small config matching the module's intended use: B=2, 16x16 field, 8 samples.
    _run_case(k1, batch=2, input_shape=(16, 16), output_shape=(8,))

    # Larger config exercising multi-P-tile accumulation, the P-split (megacore)
    # partial-sum path, and S padding (S=300 -> S_pad=384).
    _run_case(k2, batch=2, input_shape=(32, 32), output_shape=(300,), p_tile=256)

    print("KERNEL_OK")
</pallas_src>

<mosaic_0001>
module attributes {stable_mosaic.version = 11 : i64} {
  func.func @kernel(%arg0: i32, %arg1: i32, %arg2: i32, %arg3: memref<8x256xf32, #tpu.memory_space<vmem>>, %arg4: memref<8x128xf32, #tpu.memory_space<vmem>>, %arg5: memref<2x256xbf16, #tpu.memory_space<vmem>>, %arg6: memref<1x2x128xf32, #tpu.memory_space<vmem>>, %arg7: memref<2x128xf32, #tpu.memory_space<vmem>>) attributes {dimension_semantics = [#tpu.dimension_semantics<parallel>, #tpu.dimension_semantics<parallel>, #tpu.dimension_semantics<arbitrary>], iteration_bounds = array<i64: 1, 1, 1>, scalar_prefetch = 0 : i64, scratch_operands = 1 : i64, tpu.core_type = #tpu.core_type<tc>, window_params = [{transform_indices = @transform_0, window_bounds = array<i64: 8, 256>}, {transform_indices = @transform_1, window_bounds = array<i64: 8, 128>}, {transform_indices = @transform_2, window_bounds = array<i64: 2, 256>}, {transform_indices = @transform_3, window_bounds = array<i64: 1, 2, 128>}]} {
    %c0_i32 = arith.constant 0 : i32
    %0 = arith.cmpi eq, %arg2, %c0_i32 : i32
    %1 = arith.extui %0 : i1 to i32
    %c0_i32_0 = arith.constant 0 : i32
    %2 = arith.cmpi ne, %1, %c0_i32_0 : i32
    scf.if %2 {
      %cst_13 = arith.constant 0.000000e+00 : f32
      %16 = vector.broadcast %cst_13 : f32 to vector<2x128xf32>
      %c0_14 = arith.constant 0 : index
      %c0_15 = arith.constant 0 : index
      %17 = vector.load %arg7[%c0_14, %c0_15] : memref<2x128xf32, #tpu.memory_space<vmem>>, vector<2x128xf32>
      tpu.vector_store %arg7[%c0_14, %c0_15], %16 {strides = array<i32>} : memref<2x128xf32, #tpu.memory_space<vmem>>, vector<2x128xf32>,
    } else {
    }
    %c0 = arith.constant 0 : index
    %c0_1 = arith.constant 0 : index
    %3 = vector.load %arg3[%c0, %c0_1] : memref<8x256xf32, #tpu.memory_space<vmem>>, vector<8x256xf32>
    %c0_2 = arith.constant 0 : index
    %c0_3 = arith.constant 0 : index
    %4 = vector.load %arg4[%c0_2, %c0_3] : memref<8x128xf32, #tpu.memory_space<vmem>>, vector<8x128xf32>
    %cst = arith.constant dense<0.000000e+00> : vector<256x128xf32>
    %5 = tpu.matmul %3, %4, %cst {dimension_numbers = #tpu.dot_dimension_numbers<[0], [0], [1], [1], [0, 1, 1, 1], [], []>} : vector<8x256xf32>, vector<8x128xf32>, vector<256x128xf32> -> vector<256x128xf32>
    %6 = math.exp %5 : vector<256x128xf32>
    %c0_4 = arith.constant 0 : index
    %c0_5 = arith.constant 0 : index
    %7 = vector.load %arg7[%c0_4, %c0_5] : memref<2x128xf32, #tpu.memory_space<vmem>>, vector<2x128xf32>
    %c0_6 = arith.constant 0 : index
    %c0_7 = arith.constant 0 : index
    %8 = vector.load %arg5[%c0_6, %c0_7] : memref<2x256xbf16, #tpu.memory_space<vmem>>, vector<2x256xbf16>
    %9 = arith.truncf %6 : vector<256x128xf32> to vector<256x128xbf16>
    %cst_8 = arith.constant dense<0.000000e+00> : vector<2x128xf32>
    %10 = tpu.matmul %8, %9, %cst_8 {dimension_numbers = #tpu.dot_dimension_numbers<[1], [0], [0], [1], [0, 0, 1, 1], [], []>} : vector<2x256xbf16>, vector<256x128xbf16>, vector<2x128xf32> -> vector<2x128xf32>
    %11 = arith.addf %7, %10 : vector<2x128xf32>
    %c0_9 = arith.constant 0 : index
    %c0_10 = arith.constant 0 : index
    %12 = vector.load %arg7[%c0_9, %c0_10] : memref<2x128xf32, #tpu.memory_space<vmem>>, vector<2x128xf32>
    tpu.vector_store %arg7[%c0_9, %c0_10], %11 {strides = array<i32>} : memref<2x128xf32, #tpu.memory_space<vmem>>, vector<2x128xf32>,
    %c0_i32_11 = arith.constant 0 : i32
    %13 = arith.cmpi eq, %arg2, %c0_i32_11 : i32
    %14 = arith.extui %13 : i1 to i32
    %c0_i32_12 = arith.constant 0 : i32
    %15 = arith.cmpi ne, %14, %c0_i32_12 : i32
    scf.if %15 {
      %c0_13 = arith.constant 0 : index
      %c0_14 = arith.constant 0 : index
      %16 = vector.load %arg7[%c0_13, %c0_14] : memref<2x128xf32, #tpu.memory_space<vmem>>, vector<2x128xf32>
      %cst_15 = arith.constant 3.906250e-03 : f32
      %17 = vector.broadcast %cst_15 : f32 to vector<2x128xf32>
      %18 = arith.mulf %16, %17 : vector<2x128xf32>
      %c0_16 = arith.constant 0 : index
      %c0_17 = arith.constant 0 : index
      %c0_18 = arith.constant 0 : index
      %19 = vector.load %arg6[%c0_16, %c0_17, %c0_18] : memref<1x2x128xf32, #tpu.memory_space<vmem>>, vector<1x2x128xf32>
      %20 = vector.shape_cast %19 : vector<1x2x128xf32> to vector<2x128xf32>
      %21 = vector.shape_cast %18 : vector<2x128xf32> to vector<1x2x128xf32>
      tpu.vector_store %arg6[%c0_16, %c0_17, %c0_18], %21 {strides = array<i32>} : memref<1x2x128xf32, #tpu.memory_space<vmem>>, vector<1x2x128xf32>,
    } else {
    }
    return
  }
  func.func @transform_0(%arg0: i32, %arg1: i32, %arg2: i32) -> (i32, i32) {
    %c1_i32 = arith.constant 1 : i32
    %0 = arith.muli %arg0, %c1_i32 : i32
    %1 = arith.addi %0, %arg2 : i32
    %c0_i32 = arith.constant 0 : i32
    %c0_i32_0 = arith.constant 0 : i32
    return %c0_i32, %1 : i32, i32
  }
  func.func @transform_1(%arg0: i32, %arg1: i32, %arg2: i32) -> (i32, i32) {
    %c0_i32 = arith.constant 0 : i32
    %c0_i32_0 = arith.constant 0 : i32
    return %c0_i32, %arg1 : i32, i32
  }
  func.func @transform_2(%arg0: i32, %arg1: i32, %arg2: i32) -> (i32, i32) {
    %c1_i32 = arith.constant 1 : i32
    %0 = arith.muli %arg0, %c1_i32 : i32
    %1 = arith.addi %0, %arg2 : i32
    %c0_i32 = arith.constant 0 : i32
    %c0_i32_0 = arith.constant 0 : i32
    return %c0_i32, %1 : i32, i32
  }
  func.func @transform_3(%arg0: i32, %arg1: i32, %arg2: i32) -> (i32, i32, i32) {
    %c0_i32 = arith.constant 0 : i32
    %c0_i32_0 = arith.constant 0 : i32
    return %arg0, %c0_i32, %arg1 : i32, i32, i32
  }
}

</mosaic_0001>

<bundles_post_ra>
// kernel: tpu_custom_call.1
= control target key start
LH: loop header
LB: loop body
LE: loop exit
PB: predicated region body
PF: predicated region fallthrough
CT: control target
= control target key end

     0   :  { %8 = vsyncpa [#allocation4], 0  ;;  %s1092_s0 = inlined_call_operand.hbm [shape: f32[8,256], index: 0, kind: input, shape index: {}]   ;;  %s1093_s1 = inlined_call_operand.hbm [shape: f32[8,128], index: 1, kind: input, shape index: {}]   ;;  %s1094_s2 = inlined_call_operand.vmem [shape: bf16[2,256], index: 2, kind: input, shape index: {}]   ;;  %s1095_s3 = inlined_call_operand.hbm [shape: f32[1,2,128], index: 3, kind: output, shape index: {}]  }
   0x1   :  { %9 = vsyncpa [#allocation7], 0 }
   0x2   :  { %10 = vsyncpa [#allocation5], 0  ;;  %s912_s12 = smov [#allocation3]   ;;  %s913_s14 = smov [#allocation6]  }
   0x3   :  { %s21_s13 = sshll.u32 %s912_s12, 4  ;;  %s31_s15 = sshll.u32 %s913_s14, 4  ;;  %s22_s13 = int_to_ptr.vmem [resolvable:$true] %s21_s13  ;;  %s32_s15 = int_to_ptr.vmem [resolvable:$true] %s31_s15 }
   0x4   :  { %s840_s18 = scalar_lea.hbm %s1092_s0, 256 }
   0x5   :  { %p841_p0 = scmp.ne.s32.totalorder %s1092_s0, %s840_s18  ;;  %p844_p1 = scmp.lt.u32.totalorder %s840_s18, %s1092_s0 }
   0x7   :  { %p846_p2 = pnand %p844_p1, %p841_p0 }
   0x9   :  { %849 = shalt.err (!%p846_p2)
}
   0xa   :  { %s850_s23 = scalar_lea.vmem %s22_s13, 256  ;;  %p855_p4 = scmp.lt.s32.totalorder %s22_s13, %s22_s13 }
   0xb   :  { %p851_p3 = scmp.ne.s32.totalorder %s22_s13, %s850_s23  ;;  %p856_p5 = scmp.lt.s32.totalorder %s850_s23, %s850_s23 }
   0xd   :  { %p857_p6 = por %p856_p5, %p855_p4 }
   0xf   :  { %p858_p7 = pnand %p857_p6, %p851_p3 }
  0x11   :  { %861 = shalt.err (!%p858_p7)
}
  0x12   :  { %24 = dma.hbm_to_vmem [thread:$0]  %s1092_s0, 256, %s22_s13, [#allocation4]  }
  0x13   :  { %s862_s28 = scalar_lea.hbm %s1093_s1, 128 }
  0x14   :  { %p863_p8 = scmp.ne.s32.totalorder %s1093_s1, %s862_s28  ;;  %p866_p9 = scmp.lt.u32.totalorder %s862_s28, %s1093_s1 }
  0x16   :  { %p868_p10 = pnand %p866_p9, %p863_p8 }
  0x18   :  { %871 = shalt.err (!%p868_p10)
}
  0x19   :  { %s872_s6 = scalar_lea.vmem %s32_s15, 128  ;;  %p877_p12 = scmp.lt.s32.totalorder %s32_s15, %s32_s15 }
  0x1a   :  { %p873_p11 = scmp.ne.s32.totalorder %s32_s15, %s872_s6  ;;  %p878_p13 = scmp.lt.s32.totalorder %s872_s6, %s872_s6 }
  0x1c   :  { %p879_p0 = por %p878_p13, %p877_p12 }
  0x1e   :  { %p880_p1 = pnand %p879_p0, %p873_p11 }
  0x20   :  { %883 = shalt.err (!%p880_p1)
}
  0x21   :  { %34 = dma.hbm_to_vmem [thread:$0]  %s1093_s1, 128, %s32_s15, [#allocation7]  }
  0x22   :  { %906 = dma.done.wait [#allocation4], 256  }
  0x23   :  { %907 = vsyncadd [#allocation4], 4294967040 }
  0x24   :  { %908 = dma.done.wait [#allocation7], 128  }
  0x25   :  { %909 = vsyncadd [#allocation7], 4294967168  ;;  %v70_v0 = vld [vmem:[#allocation3] sm:$0xff]  ;;  %v72_v1 = vld [vmem:[#allocation6] sm:$0xff]  ;;  %vm137_vm0 = vcmask 64512   ;;  %v553_v41 = vlaneseq }
  0x26   :  { %73 = vxpose.xlu0.b32.start.end [1/1] (short) %v70_v0, 128  ;;  %721 = vmatprep.subr.mxu0 %v72_v1  ;;  %v71_v2 = vld [vmem:[#allocation3 + $0x8] sm:$0xff]  ;;  %v914_v39 = vmov 1966171168  }
  0x27   :  { %722 = vmatpush3.msra.mxu0 %v72_v1  ;;  %v551_v40 = vunpack.c.l.s4 %v914_v39  ;;  %v554_v43 = vshrl.u32 %v553_v41, 7  ;;  %v996_v44 = vld.sshfl [vmem:[%s1094_s2] sm:$0x11 pattern:$0x75316420]  ;;  %s916_s2 = smov [#allocation8]  }
  0x28   :  { %v549_v46 = vcombine.high %v996_v44, %v996_v44  ;;  %s620_s9 = sshll.u32 %s916_s2, 4  ;;  %s621_s9 = int_to_ptr.vmem [resolvable:$true] %s620_s9 }
  0x29   :  { %v552_v42 = vunpack.c.0.s8 %v551_v40  ;;  %s884_s10 = scalar_lea.vmem %s621_s9, 32  ;;  %p889_p3 = scmp.lt.s32.totalorder %s621_s9, %s621_s9 }
  0x2a   :  { %p885_p2 = scmp.ne.s32.totalorder %s621_s9, %s884_s10  ;;  %p890_p4 = scmp.lt.s32.totalorder %s884_s10, %s884_s10 }
  0x2b   :  { %v1000_v47 = vsub.s32 %v552_v42, %v554_v43 }
  0x2c   :  { %p891_p5 = por %p890_p4, %p889_p3 }
  0x2d   :  { %v563_v51 = vrot.slane %v549_v46, %v1000_v47  ;;  %v556_v52 = vrot.slane %v996_v44, %v1000_v47 }
  0x2e   :  { %p892_p6 = pnand %p891_p5, %p885_p2 }
  0x2f   :  { %598 = vmatprep.mubr.bf16.mxu1 %v563_v51 }
  0x63   :  { %105 = vxpose.xlu0.b32.start.end [1/1] (short) %v71_v2, 128 }
  0xa6   :  { %v89_v3 = vpop.trf.xlu0 }
  0xa7   :  { %723 = vmatprep.mubr.msk.f32.mxu0 %vm137_vm0, %v89_v3 }
  0xaa   :  { %v90_v4 = vpop.trf.xlu0 }
  0xab   :  { %724 = vmatmul.mubr.msk.f32.vlgmr.msra.gmra.mrb[0].mxu0 %vm137_vm0, %v90_v4 }
  0xae   :  { %v91_v5 = vpop.trf.xlu0 }
  0xaf   :  { %726 = vmatprep.mubr.msk.f32.mxu0 %vm137_vm0, %v91_v5 }
  0xb2   :  { %v92_v6 = vpop.trf.xlu0 }
  0xb3   :  { %727 = vmatmul.mubr.msk.f32.gmra.mrb[2].mxu0 %vm137_vm0, %v92_v6 }
  0xb6   :  { %v93_v7 = vpop.trf.xlu0 }
  0xb7   :  { %729 = vmatprep.mubr.msk.f32.mxu0 %vm137_vm0, %v93_v7 }
  0xba   :  { %v94_v8 = vpop.trf.xlu0 }
  0xbb   :  { %730 = vmatmul.mubr.msk.f32.gmra.mrb[4].mxu0 %vm137_vm0, %v94_v8 }
  0xbe   :  { %v95_v9 = vpop.trf.xlu0 }
  0xbf   :  { %732 = vmatprep.mubr.msk.f32.mxu0 %vm137_vm0, %v95_v9 }
  0xc2   :  { %v96_v10 = vpop.trf.xlu0 }
  0xc3   :  { %733 = vmatmul.mubr.msk.f32.gmra.mrb[6].mxu0 %vm137_vm0, %v96_v10 }
  0xc6   :  { %v97_v11 = vpop.trf.xlu0 }
  0xc7   :  { %735 = vmatprep.mubr.msk.f32.mxu0 %vm137_vm0, %v97_v11 }
  0xca   :  { %v98_v12 = vpop.trf.xlu0 }
  0xcb   :  { %736 = vmatmul.mubr.msk.f32.gmra.mrb[8].mxu0 %vm137_vm0, %v98_v12 }
  0xce   :  { %v99_v13 = vpop.trf.xlu0 }
  0xcf   :  { %738 = vmatprep.mubr.msk.f32.mxu0 %vm137_vm0, %v99_v13 }
  0xd2   :  { %v100_v14 = vpop.trf.xlu0 }
  0xd3   :  { %739 = vmatmul.mubr.msk.f32.gmra.mrb[10].mxu0 %vm137_vm0, %v100_v14 }
  0xd6   :  { %v101_v15 = vpop.trf.xlu0 }
  0xd7   :  { %741 = vmatprep.mubr.msk.f32.mxu0 %vm137_vm0, %v101_v15 }
  0xda   :  { %v102_v16 = vpop.trf.xlu0 }
  0xdb   :  { %742 = vmatmul.mubr.msk.f32.gmra.mrb[12].mxu0 %vm137_vm0, %v102_v16 }
  0xde   :  { %v103_v17 = vpop.trf.xlu0 }
  0xdf   :  { %744 = vmatprep.mubr.msk.f32.mxu0 %vm137_vm0, %v103_v17 }
  0xe2   :  { %v104_v18 = vpop.trf.xlu0 }
  0xe3   :  { %745 = vmatmul.mubr.msk.f32.gmra.mrb[14].mxu0 %vm137_vm0, %v104_v18 }
  0xe6   :  { %v121_v19 = vpop.trf.xlu0 }
  0xe7   :  { %747 = vmatprep.mubr.msk.f32.mxu0 %vm137_vm0, %v121_v19 }
  0xea   :  { %v122_v20 = vpop.trf.xlu0 }
  0xeb   :  { %748 = vmatmul.mubr.msk.f32.gmra.mrb[16].mxu0 %vm137_vm0, %v122_v20 }
  0xee   :  { %v123_v21 = vpop.trf.xlu0 }
  0xef   :  { %750 = vmatprep.mubr.msk.f32.mxu0 %vm137_vm0, %v123_v21 }
  0xf2   :  { %v124_v22 = vpop.trf.xlu0 }
  0xf3   :  { %751 = vmatmul.mubr.msk.f32.gmra.mrb[18].mxu0 %vm137_vm0, %v124_v22 }
  0xf6   :  { %v125_v23 = vpop.trf.xlu0 }
  0xf7   :  { %753 = vmatprep.mubr.msk.f32.mxu0 %vm137_vm0, %v125_v23 }
  0xfa   :  { %v126_v24 = vpop.trf.xlu0 }
  0xfb   :  { %754 = vmatmul.mubr.msk.f32.gmra.mrb[20].mxu0 %vm137_vm0, %v126_v24 }
  0xfe   :  { %v127_v25 = vpop.trf.xlu0 }
  0xff   :  { %756 = vmatprep.mubr.msk.f32.mxu0 %vm137_vm0, %v127_v25 }
 0x102   :  { %v128_v26 = vpop.trf.xlu0 }
 0x103   :  { %757 = vmatmul.mubr.msk.f32.gmra.mrb[22].mxu0 %vm137_vm0, %v128_v26 }
 0x106   :  { %v129_v27 = vpop.trf.xlu0 }
 0x107   :  { %759 = vmatprep.mubr.msk.f32.mxu0 %vm137_vm0, %v129_v27 }
 0x10a   :  { %v130_v28 = vpop.trf.xlu0 }
 0x10b   :  { %760 = vmatmul.mubr.msk.f32.gmra.mrb[24].mxu0 %vm137_vm0, %v130_v28 }
 0x10e   :  { %v131_v29 = vpop.trf.xlu0 }
 0x10f   :  { %762 = vmatprep.mubr.msk.f32.mxu0 %vm137_vm0, %v131_v29 }
 0x112   :  { %v132_v30 = vpop.trf.xlu0 }
 0x113   :  { %763 = vmatmul.mubr.msk.f32.gmra.mrb[26].mxu0 %vm137_vm0, %v132_v30 }
 0x116   :  { %v133_v31 = vpop.trf.xlu0 }
 0x117   :  { %765 = vmatprep.mubr.msk.f32.mxu0 %vm137_vm0, %v133_v31 }
 0x11a   :  { %v134_v32 = vpop.trf.xlu0 }
 0x11b   :  { %766 = vmatmul.mubr.msk.f32.gmra.mrb[28].mxu0 %vm137_vm0, %v134_v32 }
 0x11e   :  { %v135_v33 = vpop.trf.xlu0 }
 0x11f   :  { %768 = vmatprep.mubr.msk.f32.mxu0 %vm137_vm0, %v135_v33 }
 0x122   :  { %v136_v34 = vpop.trf.xlu0 }
 0x123   :  { %769 = vmatmul.mubr.msk.f32.gmra.mrb[30].mxu0 %vm137_vm0, %v136_v34 }
 0x17e   :  { %v725_v35 = vpop.f32.mrb[0].mxu0 }
 0x17f   :  { %v461_v36 = vmul.f32 1.442695, %v725_v35  ;;  %v300_v37 = vpop.f32.mrb[1].mxu0 }
 0x180   :  { %v459_v38 = vmul.f32 1.442695, %v300_v37 }
 0x181   :  { %776 = vpow2.f32 %v461_v36 }
 0x182   :  { %778 = vpow2.f32 %v459_v38 }
 0x186   :  { %v728_v45 = vpop.f32.mrb[2].mxu0 }
 0x187   :  { %v465_v48 = vmul.f32 1.442695, %v728_v45  ;;  %v310_v49 = vpop.f32.mrb[3].mxu0 }
 0x188   :  { %v463_v50 = vmul.f32 1.442695, %v310_v49 }
 0x189   :  { %780 = vpow2.f32 %v465_v48 }
 0x18a   :  { %782 = vpow2.f32 %v463_v50 }
 0x18b   :  { %v1005_v53 = vpop.eup %776 }
 0x18c   :  { %v1007_v54 = vpop.eup %778 }
 0x18d   :  { %v525_v55 = vpack.c.bf16 %v1005_v53, %v1007_v54 }
 0x18e   :  { %v731_v56 = vpop.f32.mrb[4].mxu0 }
 0x18f   :  { %v469_v57 = vmul.f32 1.442695, %v731_v56  ;;  %v320_v58 = vpop.f32.mrb[5].mxu0 }
 0x190   :  { %v467_v59 = vmul.f32 1.442695, %v320_v58 }
 0x191   :  { %784 = vpow2.f32 %v469_v57 }
 0x192   :  { %786 = vpow2.f32 %v467_v59 }
 0x193   :  { %v1011_v60 = vpop.eup %780 }
 0x194   :  { %v1013_v61 = vpop.eup %782 }
 0x195   :  { %v526_v62 = vpack.c.bf16 %v1011_v60, %v1013_v61 }
 0x196   :  { %v734_v63 = vpop.f32.mrb[6].mxu0 }
 0x197   :  { %v473_v0 = vmul.f32 1.442695, %v734_v63  ;;  %v330_v1 = vpop.f32.mrb[7].mxu0 }
 0x198   :  { %v471_v2 = vmul.f32 1.442695, %v330_v1 }
 0x199   :  { %788 = vpow2.f32 %v473_v0 }
 0x19a   :  { %790 = vpow2.f32 %v471_v2 }
 0x19b   :  { %v1017_v3 = vpop.eup %784 }
 0x19c   :  { %v1019_v4 = vpop.eup %786 }
 0x19d   :  { %v527_v5 = vpack.c.bf16 %v1017_v3, %v1019_v4 }
 0x19e   :  { %v737_v6 = vpop.f32.mrb[8].mxu0 }
 0x19f   :  { %v477_v7 = vmul.f32 1.442695, %v737_v6  ;;  %v340_v8 = vpop.f32.mrb[9].mxu0 }
 0x1a0   :  { %v475_v9 = vmul.f32 1.442695, %v340_v8 }
 0x1a1   :  { %792 = vpow2.f32 %v477_v7 }
 0x1a2   :  { %794 = vpow2.f32 %v475_v9 }
 0x1a3   :  { %v1023_v10 = vpop.eup %788 }
 0x1a4   :  { %v1025_v11 = vpop.eup %790 }
 0x1a5   :  { %v528_v12 = vpack.c.bf16 %v1023_v10, %v1025_v11 }
 0x1a6   :  { %v740_v13 = vpop.f32.mrb[10].mxu0 }
 0x1a7   :  { %v481_v14 = vmul.f32 1.442695, %v740_v13  ;;  %v350_v15 = vpop.f32.mrb[11].mxu0 }
 0x1a8   :  { %v479_v16 = vmul.f32 1.442695, %v350_v15 }
 0x1a9   :  { %796 = vpow2.f32 %v481_v14 }
 0x1aa   :  { %798 = vpow2.f32 %v479_v16 }
 0x1ab   :  { %v1029_v17 = vpop.eup %792 }
 0x1ac   :  { %v1031_v18 = vpop.eup %794 }
 0x1ad   :  { %v529_v19 = vpack.c.bf16 %v1029_v17, %v1031_v18 }
 0x1ae   :  { %v743_v20 = vpop.f32.mrb[12].mxu0 }
 0x1af   :  { %v485_v21 = vmul.f32 1.442695, %v743_v20  ;;  %v360_v22 = vpop.f32.mrb[13].mxu0 }
 0x1b0   :  { %v483_v23 = vmul.f32 1.442695, %v360_v22 }
 0x1b1   :  { %800 = vpow2.f32 %v485_v21 }
 0x1b2   :  { %802 = vpow2.f32 %v483_v23 }
 0x1b3   :  { %v1035_v24 = vpop.eup %796 }
 0x1b4   :  { %v1037_v25 = vpop.eup %798 }
 0x1b5   :  { %v530_v26 = vpack.c.bf16 %v1035_v24, %v1037_v25  ;;  %v915_v24 = vmov 0.0  }
 0x1b6   :  { %v746_v27 = vpop.f32.mrb[14].mxu0  ;;  %69 = vst [vmem:[#allocation2] sm:$0x3] %v915_v24 }
 0x1b7   :  { %v489_v28 = vmul.f32 1.442695, %v746_v27  ;;  %v370_v29 = vpop.f32.mrb[15].mxu0 }
 0x1b8   :  { %v487_v30 = vmul.f32 1.442695, %v370_v29 }
 0x1b9   :  { %804 = vpow2.f32 %v489_v28 }
 0x1ba   :  { %806 = vpow2.f32 %v487_v30 }
 0x1bb   :  { %v1041_v31 = vpop.eup %800 }
 0x1bc   :  { %v1043_v32 = vpop.eup %802 }
 0x1bd   :  { %v531_v33 = vpack.c.bf16 %v1041_v31, %v1043_v32 }
 0x1be   :  { %v749_v34 = vpop.f32.mrb[16].mxu0 }
 0x1bf   :  { %v493_v35 = vmul.f32 1.442695, %v749_v34  ;;  %v380_v36 = vpop.f32.mrb[17].mxu0 }
 0x1c0   :  { %v491_v37 = vmul.f32 1.442695, %v380_v36 }
 0x1c1   :  { %808 = vpow2.f32 %v493_v35 }
 0x1c2   :  { %810 = vpow2.f32 %v491_v37 }
 0x1c3   :  { %v1047_v38 = vpop.eup %804 }
 0x1c4   :  { %v1049_v39 = vpop.eup %806 }
 0x1c5   :  { %v532_v40 = vpack.c.bf16 %v1047_v38, %v1049_v39 }
 0x1c6   :  { %v752_v41 = vpop.f32.mrb[18].mxu0 }
 0x1c7   :  { %v497_v42 = vmul.f32 1.442695, %v752_v41  ;;  %v390_v43 = vpop.f32.mrb[19].mxu0 }
 0x1c8   :  { %v495_v45 = vmul.f32 1.442695, %v390_v43 }
 0x1c9   :  { %812 = vpow2.f32 %v497_v42 }
 0x1ca   :  { %814 = vpow2.f32 %v495_v45 }
 0x1cb   :  { %v809_v46 = vpop.eup %808 }
 0x1cc   :  { %v811_v48 = vpop.eup %810 }
 0x1cd   :  { %v533_v49 = vpack.c.bf16 %v809_v46, %v811_v48 }
 0x1ce   :  { %v755_v50 = vpop.f32.mrb[20].mxu0 }
 0x1cf   :  { %v501_v51 = vmul.f32 1.442695, %v755_v50  ;;  %v400_v56 = vpop.f32.mrb[21].mxu0  ;;  %699 = vmatprep.subr.bf16.mxu1 %v533_v49 }
 0x1d0   :  { %v499_v57 = vmul.f32 1.442695, %v400_v56  ;;  %700 = vmatpush3.bf16.msra.mxu1 %v525_v55 }
 0x1d1   :  { %816 = vpow2.f32 %v501_v51 }
 0x1d2   :  { %818 = vpow2.f32 %v499_v57 }
 0x1d3   :  { %v813_v58 = vpop.eup %812 }
 0x1d4   :  { %v815_v59 = vpop.eup %814 }
 0x1d5   :  { %v534_v63 = vpack.c.bf16 %v813_v58, %v815_v59 }
 0x1d6   :  { %v758_v0 = vpop.f32.mrb[22].mxu0 }
 0x1d7   :  { %v505_v1 = vmul.f32 1.442695, %v758_v0  ;;  %v410_v2 = vpop.f32.mrb[23].mxu0  ;;  %701 = vmatprep.subr.bf16.mxu1 %v534_v63 }
 0x1d8   :  { %v503_v6 = vmul.f32 1.442695, %v410_v2  ;;  %702 = vmatpush3.bf16.msra.mxu1 %v526_v62 }
 0x1d9   :  { %820 = vpow2.f32 %v505_v1 }
 0x1da   :  { %822 = vpow2.f32 %v503_v6 }
 0x1db   :  { %v817_v7 = vpop.eup %816 }
 0x1dc   :  { %v819_v8 = vpop.eup %818 }
 0x1dd   :  { %v535_v53 = vpack.c.bf16 %v817_v7, %v819_v8 }
 0x1de   :  { %v761_v54 = vpop.f32.mrb[24].mxu0 }
 0x1df   :  { %v509_v55 = vmul.f32 1.442695, %v761_v54  ;;  %v420_v9 = vpop.f32.mrb[25].mxu0  ;;  %703 = vmatprep.subr.bf16.mxu1 %v535_v53 }
 0x1e0   :  { %v507_v13 = vmul.f32 1.442695, %v420_v9  ;;  %704 = vmatpush3.bf16.msra.mxu1 %v527_v5 }
 0x1e1   :  { %824 = vpow2.f32 %v509_v55 }
 0x1e2   :  { %826 = vpow2.f32 %v507_v13 }
 0x1e3   :  { %v821_v14 = vpop.eup %820 }
 0x1e4   :  { %v823_v15 = vpop.eup %822 }
 0x1e5   :  { %v536_v60 = vpack.c.bf16 %v821_v14, %v823_v15 }
 0x1e6   :  { %v764_v61 = vpop.f32.mrb[26].mxu0 }
 0x1e7   :  { %v513_v62 = vmul.f32 1.442695, %v764_v61  ;;  %v430_v16 = vpop.f32.mrb[27].mxu0  ;;  %705 = vmatprep.subr.bf16.mxu1 %v536_v60 }
 0x1e8   :  { %v511_v20 = vmul.f32 1.442695, %v430_v16  ;;  %706 = vmatpush3.bf16.msra.mxu1 %v528_v12 }
 0x1e9   :  { %828 = vpow2.f32 %v513_v62 }
 0x1ea   :  { %830 = vpow2.f32 %v511_v20 }
 0x1eb   :  { %v825_v21 = vpop.eup %824 }
 0x1ec   :  { %v827_v22 = vpop.eup %826 }
 0x1ed   :  { %v537_v3 = vpack.c.bf16 %v825_v21, %v827_v22 }
 0x1ee   :  { %v767_v4 = vpop.f32.mrb[28].mxu0 }
 0x1ef   :  { %v517_v5 = vmul.f32 1.442695, %v767_v4  ;;  %v440_v23 = vpop.f32.mrb[29].mxu0  ;;  %707 = vmatprep.subr.bf16.mxu1 %v537_v3 }
 0x1f0   :  { %v515_v27 = vmul.f32 1.442695, %v440_v23  ;;  %708 = vmatpush3.bf16.msra.mxu1 %v529_v19 }
 0x1f1   :  { %832 = vpow2.f32 %v517_v5 }
 0x1f2   :  { %834 = vpow2.f32 %v515_v27 }
 0x1f3   :  { %v829_v28 = vpop.eup %828 }
 0x1f4   :  { %v831_v29 = vpop.eup %830 }
 0x1f5   :  { %v538_v10 = vpack.c.bf16 %v829_v28, %v831_v29 }
 0x1f6   :  { %v770_v11 = vpop.f32.mrb[30].mxu0 }
 0x1f7   :  { %v521_v12 = vmul.f32 1.442695, %v770_v11  ;;  %v450_v30 = vpop.f32.mrb[31].mxu0  ;;  %709 = vmatprep.subr.bf16.mxu1 %v538_v10 }
 0x1f8   :  { %v519_v34 = vmul.f32 1.442695, %v450_v30  ;;  %710 = vmatpush3.bf16.msra.mxu1 %v530_v26  ;;  %v523_v26 = vld [vmem:[#allocation2] sm:$0x3] }
 0x1f9   :  { %836 = vpow2.f32 %v521_v12 }
 0x1fa   :  { %838 = vpow2.f32 %v519_v34 }
 0x1fb   :  { %v833_v35 = vpop.eup %832 }
 0x1fc   :  { %v835_v36 = vpop.eup %834 }
 0x1fd   :  { %v539_v17 = vpack.c.bf16 %v833_v35, %v835_v36 }
 0x1ff   :  { %711 = vmatprep.subr.bf16.mxu1 %v539_v17 }
 0x200   :  { %712 = vmatpush3.bf16.msra.mxu1 %v531_v33 }
 0x203   :  { %v837_v18 = vpop.eup %836 }
 0x204   :  { %v839_v19 = vpop.eup %838 }
 0x205   :  { %v540_v37 = vpack.c.bf16 %v837_v18, %v839_v19 }
 0x207   :  { %713 = vmatprep.subr.bf16.mxu1 %v540_v37 }
 0x208   :  { %714 = vmatpush3.bf16.msra.mxu1 %v532_v40 }
 0x20b   :  { %599 = vmatmul.mubr.bf16.vlgmr.msra.gmra.mrb[0].mxu1 %v556_v52 }
 0x2de   :  { %v715_v25 = vpop.f32.mrb[0].mxu1 }
 0x2df   :  { %v716_v41 = vpop.f32.mrb[1].mxu1 }
 0x2e0   :  { %v717_v42 = vadd.f32 %v716_v41, %v715_v25  ;;  %v718_v31 = vpop.f32.mrb[2].mxu1 }
 0x2e1   :  { %v719_v32 = vpop.f32.mrb[3].mxu1 }
 0x2e2   :  { %v606_v33 = vadd.f32 %v717_v42, %v523_v26 }
 0x2e4   :  { %607 = vst [vmem:[#allocation2] sm:$0x3] %v606_v33 }
 0x2eb   :  { %v611_v43 = vld [vmem:[#allocation2] sm:$0x3] }
 0x2ec   :  { %v612_v45 = vmul.f32 0.00390625, %v611_v43 }
 0x2ee   :  { %613 = vst [vmem:[#allocation8] sm:$0x3] %v612_v45 }
 0x2ef   :  { %895 = shalt.err (!%p892_p6)
}
 0x2f0   :  { %s896_s13 = scalar_lea.hbm %s1095_s3, 32 }
 0x2f1   :  { %p897_p7 = scmp.ne.s32.totalorder %s1095_s3, %s896_s13  ;;  %p900_p8 = scmp.lt.u32.totalorder %s896_s13, %s1095_s3 }
 0x2f3   :  { %p902_p9 = pnand %p900_p8, %p897_p7 }
 0x2f5   :  { %905 = shalt.err (!%p902_p9)
}
 0x2f6   :  { %623 = dma.vmem_to_hbm [thread:$0]  %s621_s9, 32, %s1095_s3, [#allocation5]  }
 0x2f7   :  { %910 = dma.done.wait [#allocation5], 32  }
 0x2f8   :  { %911 = vsyncadd [#allocation5], 4294967264 }
 0x2f9   :  { %627 = vsyncpa [#allocation4], 1 }
 0x2fa   :  { %628 = vsyncpa [#allocation7], 1 }
 0x2fb   :  { %629 = vsyncpa [#allocation5], 1 }

</bundles_post_ra>
